<compile_context>
chip_gen: v7x
topology: tpu7x:2x2x1
jax: 0.10.0
libtpu: 0.0.40
codegen_flags: <defaults>
</compile_context>

<pallas_src>
import functools

import jax
import jax.numpy as jnp
from jax.experimental import pallas as pl
from jax.experimental.pallas import tpu as pltpu


def _iou_loss_kernel(pred_ref, tgt_ref, *rest, loc_loss_type, has_weight,
                     tile_rows, n, npad):
    if has_weight:
        w_ref, out_ref = rest
    else:
        (out_ref,) = rest

    p = pred_ref[...]          # (6, tile_rows, 128) f32
    t = tgt_ref[...]           # (6, tile_rows, 128) f32
    # channel order: 0=left 1=top 2=front 3=right 4=bottom 5=back

    # Opposite-face sums on whole 3-channel slabs (full vregs, no per-face slices).
    psum = p[0:3] + p[3:6]     # [l+r, t+b, f+k]
    tsum = t[0:3] + t[3:6]
    pred_area = psum[0] * psum[1] * psum[2]
    target_area = tsum[0] * tsum[1] * tsum[2]

    inter = jnp.minimum(p, t)  # one full-block vmin instead of 6 slice-mins
    isum = inter[0:3] + inter[3:6]
    area_intersect = isum[0] * isum[1] * isum[2]
    area_union = target_area + pred_area - area_intersect
    ious = (area_intersect + 1.0) / (area_union + 1.0)

    if loc_loss_type == 'iou':
        loss = -jnp.log(ious)
    elif loc_loss_type == 'niou':
        loss = 1.0 - ious
    elif loc_loss_type == 'giou':
        enc = jnp.maximum(p, t)            # one full-block vmax
        gsum = enc[0:3] + enc[3:6]
        g_intersect = gsum[0] * gsum[1] * gsum[2] + 1e-7
        gious = ious - (g_intersect - area_union) / g_intersect
        loss = 1.0 - gious
    else:
        raise ValueError(f"unknown loc_loss_type: {loc_loss_type}")

    if n < npad:
        # Zero the padded tail (giou padding entries would contribute loss == 1).
        rows = jax.lax.broadcasted_iota(jnp.int32, (tile_rows, 128), 0)
        lanes = jax.lax.broadcasted_iota(jnp.int32, (tile_rows, 128), 1)
        idx = pl.program_id(0) * (tile_rows * 128) + rows * 128 + lanes
        loss = jnp.where(idx < n, loss, 0.0)

    if has_weight:
        w = w_ref[...]                                    # padding already 0
        lw_p = jnp.sum(loss * w, axis=0, keepdims=True)   # (1, 128)
        w_p = jnp.sum(w, axis=0, keepdims=True)           # (1, 128)
        l_p = jnp.sum(loss, axis=0, keepdims=True)        # (1, 128)
        out_ref[0] = jnp.concatenate([lw_p, w_p, l_p], axis=0)   # (3, 128)
    else:
        out_ref[0] = jnp.sum(loss, axis=0, keepdims=True)        # (1, 128)


def _round_up(x, m):
    return ((x + m - 1) // m) * m


@functools.partial(jax.jit, static_argnames=('loc_loss_type',))
def iou_loss(out, target, weight=None, loc_loss_type='iou'):
    """JAX/Pallas equivalent of IOULoss(loc_loss_type)(out, target, weight)."""
    n = out.shape[0]
    assert out.shape == (n, 6) and target.shape == (n, 6)

    rows_needed = max(1, -(-n // 128))
    # 8..256 rows per tile -> 1024..32768 samples per grid step.  At the cap a
    # block is ~0.4 MiB per input (~1.6 MiB double-buffered), far under the
    # scoped-VMEM default on v5e/v6e/v7x, while amortizing the ~0.35 us
    # per-grid-step overhead for large N.
    tile_rows = min(_round_up(rows_needed, 8), 256)
    num_tiles = -(-rows_needed // tile_rows)
    total_rows = num_tiles * tile_rows
    npad = total_rows * 128

    pred_cf = jnp.pad(out.astype(jnp.float32).T, ((0, 0), (0, npad - n)))
    pred_cf = pred_cf.reshape(6, total_rows, 128)
    tgt_cf = jnp.pad(target.astype(jnp.float32).T, ((0, 0), (0, npad - n)))
    tgt_cf = tgt_cf.reshape(6, total_rows, 128)

    has_weight = weight is not None
    operands = [pred_cf, tgt_cf]
    in_specs = [
        pl.BlockSpec((6, tile_rows, 128), lambda i: (0, i, 0)),
        pl.BlockSpec((6, tile_rows, 128), lambda i: (0, i, 0)),
    ]
    if has_weight:
        w_cf = jnp.pad(weight.astype(jnp.float32), (0, npad - n))
        w_cf = w_cf.reshape(total_rows, 128)
        operands.append(w_cf)
        in_specs.append(pl.BlockSpec((tile_rows, 128), lambda i: (i, 0)))
    out_rows = 3 if has_weight else 1

    kernel = functools.partial(
        _iou_loss_kernel, loc_loss_type=loc_loss_type, has_weight=has_weight,
        tile_rows=tile_rows, n=n, npad=npad)
    partials = pl.pallas_call(
        kernel,
        out_shape=jax.ShapeDtypeStruct((num_tiles, out_rows, 128), jnp.float32),
        grid_spec=pltpu.PrefetchScalarGridSpec(
            num_scalar_prefetch=0,
            grid=(num_tiles,),
            in_specs=in_specs,
            out_specs=pl.BlockSpec((1, out_rows, 128), lambda i: (i, 0, 0)),
        ),
        compiler_params=pltpu.CompilerParams(
            dimension_semantics=("parallel",)),   # v7x: tiles shard across 2 TCs
    )(*operands)

    # Final tiny reduction + PyTorch branch semantics in plain JAX.
    if not has_weight:
        return jnp.sum(partials) / jnp.float32(n)

    sums = jnp.sum(partials, axis=(0, 2))   # (3,): [sum(loss*w), sum(w), sum(loss)]
    wloss_sum, wsum, loss_sum = sums[0], sums[1], sums[2]
    mean_loss = loss_sum / jnp.float32(n)
    # weighted mean iff weight.sum() > 0, else plain mean (matches PyTorch).
    return jnp.where(wsum > 0, wloss_sum / jnp.where(wsum > 0, wsum, 1.0), mean_loss)


def _ref_iou_loss(out, target, weight=None, loc_loss_type='iou'):
    """Pure-JAX reference mirroring the PyTorch module (sanity check)."""
    pl_, pt, pf, pr, pb, pk = [out[:, i] for i in range(6)]
    tl, tt, tf, tr, tb, tk = [target[:, i] for i in range(6)]
    target_area = (tl + tr) * (tt + tb) * (tf + tk)
    pred_area = (pl_ + pr) * (pt + pb) * (pf + pk)
    w_i = jnp.minimum(pl_, tl) + jnp.minimum(pr, tr)
    h_i = jnp.minimum(pb, tb) + jnp.minimum(pt, tt)
    d_i = jnp.minimum(pf, tf) + jnp.minimum(pk, tk)
    area_i = w_i * h_i * d_i
    area_u = target_area + pred_area - area_i
    ious = (area_i + 1.0) / (area_u + 1.0)
    if loc_loss_type == 'iou':
        loss = -jnp.log(ious)
    elif loc_loss_type == 'niou':
        loss = 1.0 - ious
    elif loc_loss_type == 'giou':
        g_w = jnp.maximum(pl_, tl) + jnp.maximum(pr, tr)
        g_h = jnp.maximum(pb, tb) + jnp.maximum(pt, tt)
        g_d = jnp.maximum(pf, tf) + jnp.maximum(pk, tk)
        g_int = g_w * g_h * g_d + 1e-7
        gious = ious - (g_int - area_u) / g_int
        loss = 1.0 - gious
    if weight is not None and jnp.sum(weight) > 0:
        return jnp.sum(loss * weight) / jnp.sum(weight)
    return jnp.mean(loss)


if __name__ == "__main__":
    key = jax.random.PRNGKey(0)
    k1, k2, k3 = jax.random.split(key, 3)
    N = 200  # number of positive locations; regression targets are (N, 6)
    out = jax.random.uniform(k1, (N, 6), jnp.float32, minval=0.1, maxval=5.0)
    target = jax.random.uniform(k2, (N, 6), jnp.float32, minval=0.1, maxval=5.0)
    weight = jax.random.uniform(k3, (N,), jnp.float32, minval=0.0, maxval=1.0)

    for loss_type in ('iou', 'niou', 'giou'):
        got_w = iou_loss(out, target, weight, loc_loss_type=loss_type)
        ref_w = _ref_iou_loss(out, target, weight, loc_loss_type=loss_type)
        jax.block_until_ready(got_w)
        assert jnp.allclose(got_w, ref_w, rtol=1e-5, atol=1e-5), (loss_type, got_w, ref_w)

    # No-weight branch (plain mean), including giou padding correction.
    got_nw = iou_loss(out, target, None, loc_loss_type='giou')
    ref_nw = _ref_iou_loss(out, target, None, loc_loss_type='giou')
    jax.block_until_ready(got_nw)
    assert jnp.allclose(got_nw, ref_nw, rtol=1e-5, atol=1e-5), (got_nw, ref_nw)

    # Multi-tile path (grid > 1, in-kernel tail masking across tiles).
    k4, k5, k6 = jax.random.split(jax.random.PRNGKey(1), 3)
    M = 40000
    out_l = jax.random.uniform(k4, (M, 6), jnp.float32, minval=0.1, maxval=5.0)
    tgt_l = jax.random.uniform(k5, (M, 6), jnp.float32, minval=0.1, maxval=5.0)
    w_l = jax.random.uniform(k6, (M,), jnp.float32, minval=0.0, maxval=1.0)
    got_l = iou_loss(out_l, tgt_l, w_l, loc_loss_type='giou')
    ref_l = _ref_iou_loss(out_l, tgt_l, w_l, loc_loss_type='giou')
    jax.block_until_ready(got_l)
    assert jnp.allclose(got_l, ref_l, rtol=1e-4, atol=1e-5), (got_l, ref_l)

    print("KERNEL_OK")
</pallas_src>

<mosaic_0001>
module attributes {stable_mosaic.version = 11 : i64} {
  func.func @_iou_loss_kernel(%arg0: i32, %arg1: memref<6x8x128xf32, #tpu.memory_space<vmem>>, %arg2: memref<6x8x128xf32, #tpu.memory_space<vmem>>, %arg3: memref<8x128xf32, #tpu.memory_space<vmem>>, %arg4: memref<1x3x128xf32, #tpu.memory_space<vmem>>) attributes {dimension_semantics = [#tpu.dimension_semantics<parallel>], iteration_bounds = array<i64: 1>, scalar_prefetch = 0 : i64, scratch_operands = 0 : i64, tpu.core_type = #tpu.core_type<tc>, window_params = [{transform_indices = @transform_0, window_bounds = array<i64: 6, 8, 128>}, {transform_indices = @transform_1, window_bounds = array<i64: 6, 8, 128>}, {transform_indices = @transform_2, window_bounds = array<i64: 8, 128>}, {transform_indices = @transform_3, window_bounds = array<i64: 1, 3, 128>}]} {
    %c0 = arith.constant 0 : index
    %c0_0 = arith.constant 0 : index
    %c0_1 = arith.constant 0 : index
    %0 = vector.load %arg1[%c0, %c0_0, %c0_1] : memref<6x8x128xf32, #tpu.memory_space<vmem>>, vector<6x8x128xf32>
    %c0_2 = arith.constant 0 : index
    %c0_3 = arith.constant 0 : index
    %c0_4 = arith.constant 0 : index
    %1 = vector.load %arg2[%c0_2, %c0_3, %c0_4] : memref<6x8x128xf32, #tpu.memory_space<vmem>>, vector<6x8x128xf32>
    %2 = vector.extract_strided_slice %0 {offsets = [0, 0, 0], sizes = [3, 8, 128], strides = [1, 1, 1]} : vector<6x8x128xf32> to vector<3x8x128xf32>
    %3 = vector.extract_strided_slice %0 {offsets = [3, 0, 0], sizes = [3, 8, 128], strides = [1, 1, 1]} : vector<6x8x128xf32> to vector<3x8x128xf32>
    %4 = arith.addf %2, %3 : vector<3x8x128xf32>
    %5 = vector.extract_strided_slice %1 {offsets = [0, 0, 0], sizes = [3, 8, 128], strides = [1, 1, 1]} : vector<6x8x128xf32> to vector<3x8x128xf32>
    %6 = vector.extract_strided_slice %1 {offsets = [3, 0, 0], sizes = [3, 8, 128], strides = [1, 1, 1]} : vector<6x8x128xf32> to vector<3x8x128xf32>
    %7 = arith.addf %5, %6 : vector<3x8x128xf32>
    %8 = vector.extract_strided_slice %4 {offsets = [0, 0, 0], sizes = [1, 8, 128], strides = [1, 1, 1]} : vector<3x8x128xf32> to vector<1x8x128xf32>
    %9 = vector.shape_cast %8 : vector<1x8x128xf32> to vector<8x128xf32>
    %10 = vector.extract_strided_slice %4 {offsets = [1, 0, 0], sizes = [1, 8, 128], strides = [1, 1, 1]} : vector<3x8x128xf32> to vector<1x8x128xf32>
    %11 = vector.shape_cast %10 : vector<1x8x128xf32> to vector<8x128xf32>
    %12 = arith.mulf %9, %11 : vector<8x128xf32>
    %13 = vector.extract_strided_slice %4 {offsets = [2, 0, 0], sizes = [1, 8, 128], strides = [1, 1, 1]} : vector<3x8x128xf32> to vector<1x8x128xf32>
    %14 = vector.shape_cast %13 : vector<1x8x128xf32> to vector<8x128xf32>
    %15 = arith.mulf %12, %14 : vector<8x128xf32>
    %16 = vector.extract_strided_slice %7 {offsets = [0, 0, 0], sizes = [1, 8, 128], strides = [1, 1, 1]} : vector<3x8x128xf32> to vector<1x8x128xf32>
    %17 = vector.shape_cast %16 : vector<1x8x128xf32> to vector<8x128xf32>
    %18 = vector.extract_strided_slice %7 {offsets = [1, 0, 0], sizes = [1, 8, 128], strides = [1, 1, 1]} : vector<3x8x128xf32> to vector<1x8x128xf32>
    %19 = vector.shape_cast %18 : vector<1x8x128xf32> to vector<8x128xf32>
    %20 = arith.mulf %17, %19 : vector<8x128xf32>
    %21 = vector.extract_strided_slice %7 {offsets = [2, 0, 0], sizes = [1, 8, 128], strides = [1, 1, 1]} : vector<3x8x128xf32> to vector<1x8x128xf32>
    %22 = vector.shape_cast %21 : vector<1x8x128xf32> to vector<8x128xf32>
    %23 = arith.mulf %20, %22 : vector<8x128xf32>
    %24 = arith.minimumf %0, %1 : vector<6x8x128xf32>
    %25 = vector.extract_strided_slice %24 {offsets = [0, 0, 0], sizes = [3, 8, 128], strides = [1, 1, 1]} : vector<6x8x128xf32> to vector<3x8x128xf32>
    %26 = vector.extract_strided_slice %24 {offsets = [3, 0, 0], sizes = [3, 8, 128], strides = [1, 1, 1]} : vector<6x8x128xf32> to vector<3x8x128xf32>
    %27 = arith.addf %25, %26 : vector<3x8x128xf32>
    %28 = vector.extract_strided_slice %27 {offsets = [0, 0, 0], sizes = [1, 8, 128], strides = [1, 1, 1]} : vector<3x8x128xf32> to vector<1x8x128xf32>
    %29 = vector.shape_cast %28 : vector<1x8x128xf32> to vector<8x128xf32>
    %30 = vector.extract_strided_slice %27 {offsets = [1, 0, 0], sizes = [1, 8, 128], strides = [1, 1, 1]} : vector<3x8x128xf32> to vector<1x8x128xf32>
    %31 = vector.shape_cast %30 : vector<1x8x128xf32> to vector<8x128xf32>
    %32 = arith.mulf %29, %31 : vector<8x128xf32>
    %33 = vector.extract_strided_slice %27 {offsets = [2, 0, 0], sizes = [1, 8, 128], strides = [1, 1, 1]} : vector<3x8x128xf32> to vector<1x8x128xf32>
    %34 = vector.shape_cast %33 : vector<1x8x128xf32> to vector<8x128xf32>
    %35 = arith.mulf %32, %34 : vector<8x128xf32>
    %36 = arith.addf %23, %15 : vector<8x128xf32>
    %37 = arith.subf %36, %35 : vector<8x128xf32>
    %cst = arith.constant 1.000000e+00 : f32
    %38 = vector.broadcast %cst : f32 to vector<8x128xf32>
    %39 = arith.addf %35, %38 : vector<8x128xf32>
    %cst_5 = arith.constant 1.000000e+00 : f32
    %40 = vector.broadcast %cst_5 : f32 to vector<8x128xf32>
    %41 = arith.addf %37, %40 : vector<8x128xf32>
    %42 = arith.divf %39, %41 : vector<8x128xf32>
    %43 = math.log %42 : vector<8x128xf32>
    %cst_6 = arith.constant 0.000000e+00 : f32
    %44 = vector.broadcast %cst_6 : f32 to vector<8x128xf32>
    %45 = arith.subf %44, %43 : vector<8x128xf32>
    %46 = tpu.iota {dimensions = array<i32: 0>} : vector<8x128xi32>
    %47 = tpu.iota {dimensions = array<i32: 1>} : vector<8x128xi32>
    %c1024_i32 = arith.constant 1024 : i32
    %48 = arith.muli %arg0, %c1024_i32 : i32
    %c128_i32 = arith.constant 128 : i32
    %49 = vector.broadcast %c128_i32 : i32 to vector<8x128xi32>
    %50 = arith.muli %46, %49 : vector<8x128xi32>
    %51 = vector.broadcast %48 : i32 to vector<8x128xi32>
    %52 = arith.addi %51, %50 : vector<8x128xi32>
    %53 = arith.addi %52, %47 : vector<8x128xi32>
    %c200_i32 = arith.constant 200 : i32
    %54 = vector.broadcast %c200_i32 : i32 to vector<8x128xi32>
    %55 = arith.cmpi slt, %53, %54 : vector<8x128xi32>
    %cst_7 = arith.constant 0.000000e+00 : f32
    %56 = vector.broadcast %cst_7 : f32 to vector<8x128xf32>
    %57 = arith.select %55, %45, %56 : vector<8x128xi1>, vector<8x128xf32>
    %c0_8 = arith.constant 0 : index
    %c0_9 = arith.constant 0 : index
    %58 = vector.load %arg3[%c0_8, %c0_9] : memref<8x128xf32, #tpu.memory_space<vmem>>, vector<8x128xf32>
    %59 = arith.mulf %57, %58 : vector<8x128xf32>
    %cst_10 = arith.constant dense<0.000000e+00> : vector<128xf32>
    %60 = vector.multi_reduction <add>, %59, %cst_10 [0] : vector<8x128xf32> to vector<128xf32>
    %61 = vector.shape_cast %60 : vector<128xf32> to vector<1x128xf32>
    %cst_11 = arith.constant dense<0.000000e+00> : vector<128xf32>
    %62 = vector.multi_reduction <add>, %58, %cst_11 [0] : vector<8x128xf32> to vector<128xf32>
    %63 = vector.shape_cast %62 : vector<128xf32> to vector<1x128xf32>
    %cst_12 = arith.constant dense<0.000000e+00> : vector<128xf32>
    %64 = vector.multi_reduction <add>, %57, %cst_12 [0] : vector<8x128xf32> to vector<128xf32>
    %65 = vector.shape_cast %64 : vector<128xf32> to vector<1x128xf32>
    %66 = tpu.concatenate %61, %63, %65 in 0 : vector<1x128xf32>, vector<1x128xf32>, vector<1x128xf32> -> vector<3x128xf32>
    %c0_13 = arith.constant 0 : index
    %c0_14 = arith.constant 0 : index
    %c0_15 = arith.constant 0 : index
    %67 = vector.load %arg4[%c0_13, %c0_14, %c0_15] : memref<1x3x128xf32, #tpu.memory_space<vmem>>, vector<1x3x128xf32>
    %68 = vector.shape_cast %67 : vector<1x3x128xf32> to vector<3x128xf32>
    %69 = vector.shape_cast %66 : vector<3x128xf32> to vector<1x3x128xf32>
    tpu.vector_store %arg4[%c0_13, %c0_14, %c0_15], %69 {strides = array<i32>} : memref<1x3x128xf32, #tpu.memory_space<vmem>>, vector<1x3x128xf32>,
    return
  }
  func.func @transform_0(%arg0: i32) -> (i32, i32, i32) {
    %c0_i32 = arith.constant 0 : i32
    %c0_i32_0 = arith.constant 0 : i32
    %c0_i32_1 = arith.constant 0 : i32
    return %c0_i32, %arg0, %c0_i32_0 : i32, i32, i32
  }
  func.func @transform_1(%arg0: i32) -> (i32, i32, i32) {
    %c0_i32 = arith.constant 0 : i32
    %c0_i32_0 = arith.constant 0 : i32
    %c0_i32_1 = arith.constant 0 : i32
    return %c0_i32, %arg0, %c0_i32_0 : i32, i32, i32
  }
  func.func @transform_2(%arg0: i32) -> (i32, i32) {
    %c0_i32 = arith.constant 0 : i32
    %c0_i32_0 = arith.constant 0 : i32
    return %arg0, %c0_i32 : i32, i32
  }
  func.func @transform_3(%arg0: i32) -> (i32, i32, i32) {
    %c0_i32 = arith.constant 0 : i32
    %c0_i32_0 = arith.constant 0 : i32
    %c0_i32_1 = arith.constant 0 : i32
    return %arg0, %c0_i32, %c0_i32_0 : i32, i32, i32
  }
}

</mosaic_0001>

<bundles_post_ra>
// kernel: iou_loss.1
= control target key start
LH: loop header
LB: loop body
LE: loop exit
PB: predicated region body
PF: predicated region fallthrough
CT: control target
= control target key end

     0   :  { %v56_v37 = vlaneseq  ;;  %vm87_vm1 = vcmask 1040384   ;;  %vm89_vm2 = vcmask 1041408   ;;  %s162_s0 = inlined_call_operand.vmem [shape: f32[6,8,128], index: 0, kind: input, shape index: {}]   ;;  %s163_s1 = inlined_call_operand.vmem [shape: f32[6,8,128], index: 1, kind: input, shape index: {}]   ;;  %s164_s2 = inlined_call_operand.vmem [shape: f32[8,128], index: 2, kind: input, shape index: {}]   ;;  %s165_s3 = inlined_call_operand.vmem [shape: f32[1,3,128], index: 3, kind: output, shape index: {}]  }
   0x1   :  { %v14_v0 = vld [vmem:[%s162_s0] sm:$0xff]  ;;  %v15_v1 = vld [vmem:[%s162_s0 + $0x8] sm:$0xff]  ;;  %v16_v2 = vld [vmem:[%s162_s0 + $0x10] sm:$0xff] }
   0x2   :  { %v17_v3 = vld [vmem:[%s162_s0 + $0x18] sm:$0xff]  ;;  %v18_v4 = vld [vmem:[%s162_s0 + $0x20] sm:$0xff]  ;;  %v19_v5 = vld [vmem:[%s162_s0 + $0x28] sm:$0xff]  ;;  %v57_v40 = vshrl.u32 %v56_v37, 7  ;;  %v59_v41 = vand.u32 127, %v56_v37 }
   0x3   :  { %v20_v6 = vld [vmem:[%s163_s1] sm:$0xff]  ;;  %v21_v7 = vld [vmem:[%s163_s1 + $0x8] sm:$0xff]  ;;  %v22_v8 = vld [vmem:[%s163_s1 + $0x10] sm:$0xff]  ;;  %v26_v9 = vadd.f32 %v17_v3, %v14_v0  ;;  %v27_v10 = vadd.f32 %v18_v4, %v15_v1  ;;  %v28_v11 = vadd.f32 %v19_v5, %v16_v2 }
   0x4   :  { %v23_v12 = vld [vmem:[%s163_s1 + $0x18] sm:$0xff]  ;;  %v24_v13 = vld [vmem:[%s163_s1 + $0x20] sm:$0xff]  ;;  %v25_v14 = vld [vmem:[%s163_s1 + $0x28] sm:$0xff]  ;;  %v36_v15 = vmin.f32 %v14_v0, %v20_v6  ;;  %v37_v16 = vmin.f32 %v15_v1, %v21_v7  ;;  %v38_v17 = vmin.f32 %v16_v2, %v22_v8  ;;  %v61_v42 = vmul.u32 128, %v57_v40 }
   0x5   :  { %v29_v18 = vadd.f32 %v23_v12, %v20_v6  ;;  %v30_v19 = vadd.f32 %v24_v13, %v21_v7  ;;  %v31_v20 = vadd.f32 %v25_v14, %v22_v8  ;;  %v32_v21 = vmul.f32 %v27_v10, %v26_v9  ;;  %v67_v43 = vld [vmem:[%s164_s2] sm:$0xff] }
   0x6   :  { %v39_v22 = vmin.f32 %v17_v3, %v23_v12  ;;  %v40_v23 = vmin.f32 %v18_v4, %v24_v13  ;;  %v41_v24 = vmin.f32 %v19_v5, %v25_v14  ;;  %v75_v44 = vrot.slane %v67_v43, 4 }
   0x7   :  { %v33_v25 = vmul.f32 %v32_v21, %v28_v11  ;;  %v34_v26 = vmul.f32 %v30_v19, %v29_v18  ;;  %v64_v45 = vadd.s32 %v61_v42, %v59_v41 }
   0x8   :  { %v42_v27 = vadd.f32 %v39_v22, %v36_v15  ;;  %v43_v28 = vadd.f32 %v40_v23, %v37_v16  ;;  %v44_v29 = vadd.f32 %v41_v24, %v38_v17  ;;  %v76_v47 = vadd.f32 %v75_v44, %v67_v43 }
   0x9   :  { %v35_v30 = vmul.f32 %v34_v26, %v31_v20  ;;  %vm65_vm0 = vcmp.lt.s32.totalorder %v64_v45, 200 }
   0xa   :  { %v45_v31 = vmul.f32 %v43_v28, %v42_v27  ;;  %v77_v50 = vrot.slane %v76_v47, 2 }
   0xb   :  { %v47_v32 = vadd.f32 %v35_v30, %v33_v25 }
   0xc   :  { %v46_v33 = vmul.f32 %v45_v31, %v44_v29  ;;  %v78_v55 = vadd.f32 %v77_v50, %v76_v47 }
   0xe   :  { %v48_v34 = vsub.f32 %v47_v32, %v46_v33  ;;  %v49_v36 = vadd.f32 1.0, %v46_v33  ;;  %v79_v60 = vrot.slane %v78_v55, 1 }
  0x10   :  { %v50_v35 = vadd.f32 1.0, %v48_v34  ;;  %v80_v1 = vadd.f32 %v79_v60, %v78_v55 }
  0x12   :  { %96 = vrcp.f32 %v50_v35 }
  0x1c   :  { %v97_v38 = vpop.eup %96 }
  0x1d   :  { %v52_v39 = vmul.f32 %v97_v38, %v49_v36 }
  0x1f   :  { %98 = vlog2.f32 %v52_v39 }
  0x29   :  { %v99_v46 = vpop.eup %98 }
  0x2a   :  { %v54_v48 = vmul.f32 0.6931472, %v99_v46 }
  0x2c   :  { %v55_v49 = vsub.f32 0.0, %v54_v48 }
  0x2e   :  { %v66_v51 = vsel %vm65_vm0, %v55_v49, 0.0 }
  0x2f   :  { %v68_v52 = vmul.f32 %v67_v43, %v66_v51  ;;  %v81_v53 = vrot.slane %v66_v51, 4 }
  0x31   :  { %v69_v54 = vrot.slane %v68_v52, 4  ;;  %v82_v56 = vadd.f32 %v81_v53, %v66_v51 }
  0x33   :  { %v70_v57 = vadd.f32 %v69_v54, %v68_v52  ;;  %v83_v58 = vrot.slane %v82_v56, 2 }
  0x35   :  { %v71_v59 = vrot.slane %v70_v57, 2  ;;  %v84_v61 = vadd.f32 %v83_v58, %v82_v56 }
  0x37   :  { %v72_v62 = vadd.f32 %v71_v59, %v70_v57  ;;  %v85_v63 = vrot.slane %v84_v61, 1 }
  0x39   :  { %v73_v0 = vrot.slane %v72_v62, 1  ;;  %v86_v2 = vadd.f32 %v85_v63, %v84_v61 }
  0x3b   :  { %v74_v3 = vadd.f32 %v73_v0, %v72_v62 }
  0x3d   :  { %v88_v4 = vsel %vm87_vm1, %v74_v3, %v80_v1 }
  0x3e   :  { %v90_v5 = vsel %vm89_vm2, %v88_v4, %v86_v2 }
  0x3f   :  { %91 = vst [vmem:[%s165_s3] sm:$0x7] %v90_v5 }

</bundles_post_ra>
